<compile_context>
chip_gen: v6e
topology: v6e:2x2x1
jax: 0.10.0
libtpu: 0.0.40
codegen_flags: <defaults>
</compile_context>

<pallas_src>
import functools

import jax
import jax.numpy as jnp
from jax.experimental import pallas as pl
from jax.experimental.pallas import tpu as pltpu

MARGIN = 2.0
EPS = 1e-6  # matches torch.nn.functional.pairwise_distance default eps


def _round_up(x, m):
    return ((x + m - 1) // m) * m


def _vmem_capacity_bytes():
    """Physical VMEM of the attached TPU; conservative (v7x-sized) fallback."""
    try:
        info = pltpu.get_tpu_info()
        cap = getattr(info, "vmem_capacity_bytes", None)
        if cap:
            return int(cap)
    except Exception:
        pass
    return 64 * 1024 * 1024


def _contrastive_loss_kernel(*refs, margin, packed):
    """One batch tile: per-sample contrastive loss.

    packed=True : refs = (o1, o2, lbl, seg, out)
        o1, o2 : (tile, k*D)   k samples packed per 128-lane row
        lbl    : (tile, k)     packed labels
        seg    : (k*D, k)      0/1 segment matrix (grid-invariant input)
        out    : (tile, k)     packed per-sample losses
    packed=False: refs = (o1, o2, lbl, out); feature dim reduced directly.
    """
    if packed:
        o1_ref, o2_ref, lbl_ref, seg_ref, out_ref = refs
    else:
        o1_ref, o2_ref, lbl_ref, out_ref = refs

    diff = (o1_ref[...].astype(jnp.float32)
            - o2_ref[...].astype(jnp.float32)) + jnp.float32(EPS)
    sq = diff * diff                                            # (T, Dp)  VPU

    if packed:
        # Segmented per-sample reduce over the k samples packed in each row,
        # expressed as a tiny matmul on the otherwise idle MXU.  HIGHEST keeps
        # the f32 sum exact.  NOTE: per-operand (HIGHEST, DEFAULT) precision
        # would halve the MXU passes (the 0/1 seg matrix is exact in bf16) but
        # the Mosaic lowering requires symmetric operand precision; the extra
        # passes are fully hidden under the input DMA in this mem-bound kernel.
        dist_sq = jnp.dot(sq, seg_ref[...],
                          precision=jax.lax.Precision.HIGHEST,
                          preferred_element_type=jnp.float32)   # (T, k)
    else:
        # Generic path: plain per-row reduction over the feature (lane) axis.
        dist_sq = jnp.sum(sq, axis=1, keepdims=True)            # (T, 1)

    dist = jnp.sqrt(dist_sq)                                    # EUP
    lbl = lbl_ref[...].astype(jnp.float32)                      # (T, k)
    hinge = jnp.maximum(jnp.float32(margin) - dist, 0.0)
    out_ref[...] = (1.0 - lbl) * dist_sq + lbl * (hinge * hinge)


def contrastive_loss(output1, output2, label, *, margin=MARGIN):
    """output1, output2: (B, D); label: (B,) or (B, 1). Returns scalar f32 loss."""
    B, D = output1.shape
    label = jnp.asarray(label).reshape(-1).astype(jnp.float32)

    in_itemsize = jnp.dtype(output1.dtype).itemsize
    # dtype-specific sublane multiple: 8 for f32, 16 for bf16, 32 for int8/fp8.
    sub = max(8, 32 // in_itemsize)

    # --- relaxed lane-dense packing -----------------------------------------
    # Floor packing: for any D < 128 with k = 128 // D >= 2, fold k samples
    # into each (near-)128-lane row; pad B up to a multiple of k (padded rows
    # are sliced away before the final mean, so their value is irrelevant).
    k = 128 // D if D < 128 else 1
    if k < 2:
        k = 1
    B_k = _round_up(B, k)
    if B_k != B:
        pad = B_k - B
        output1 = jnp.pad(output1, ((0, pad), (0, 0)))
        output2 = jnp.pad(output2, ((0, pad), (0, 0)))
        label = jnp.pad(label, (0, pad))
    Dp = k * D            # packed feature width (lane axis), 65..128 when k>1
    Bp = B_k // k         # packed row count

    o1 = output1.reshape(Bp, Dp)        # free row-major reshapes
    o2 = output2.reshape(Bp, Dp)
    lab = label.reshape(Bp, k)

    # --- per-generation VMEM budget ------------------------------------------
    vmem_cap = _vmem_capacity_bytes()
    if vmem_cap >= 100 * 1024 * 1024:
        # v5e / v6e: 128 MiB physical VMEM (default scoped limit is only
        # 16/32 MiB, so the explicit limit below is what unlocks big blocks).
        vmem_limit = 64 * 1024 * 1024
        resident_budget = 32 * 1024 * 1024
        small_vmem = False
    else:
        # v7x-class: 64 MiB physical VMEM and 2 TensorCores -> keep headroom.
        vmem_limit = 32 * 1024 * 1024
        resident_budget = 12 * 1024 * 1024
        small_vmem = True

    # Corrected accounting: per row, per pipeline buffer =
    #   2 embedding inputs (lane-padded to a 128 multiple)
    # + label block + loss block, each lane-padded to 128 f32 lanes (512 B/row).
    Dp_lanes = _round_up(Dp, 128)
    per_row_bytes = 2 * Dp_lanes * in_itemsize + 2 * 128 * 4
    budget_rows = resident_budget // (2 * per_row_bytes)       # x2 double-buffer
    budget_rows = max(sub, (budget_rows // sub) * sub)

    Bp_rounded = _round_up(Bp, sub)
    tile = min(Bp_rounded, budget_rows, 8192)
    if small_vmem and Bp_rounded >= 2 * sub:
        # v7x: keep >= 2 grid steps so ("parallel",) can use both TensorCores.
        tile = min(tile, _round_up(-(-Bp_rounded // 2), sub))
    tile = max(sub, (tile // sub) * sub)

    Bp_pad = _round_up(Bp, tile)
    if Bp_pad != Bp:
        pad = Bp_pad - Bp
        o1 = jnp.pad(o1, ((0, pad), (0, 0)))
        o2 = jnp.pad(o2, ((0, pad), (0, 0)))
        lab = jnp.pad(lab, ((0, pad), (0, 0)))

    grid = (Bp_pad // tile,)
    packed = k > 1
    kernel = functools.partial(_contrastive_loss_kernel,
                               margin=float(margin), packed=packed)

    in_specs = [
        pl.BlockSpec((tile, Dp), lambda i: (i, 0)),
        pl.BlockSpec((tile, Dp), lambda i: (i, 0)),
        pl.BlockSpec((tile, k), lambda i: (i, 0)),
    ]
    inputs = [o1, o2, lab]
    if packed:
        # Grid-invariant 0/1 segment matrix (sample j occupies lanes
        # [j*D, (j+1)*D) of a packed row).  Constant index_map -> the block is
        # hoisted out of the grid loop and fetched once.
        seg = (jnp.arange(Dp)[:, None] // D
               == jnp.arange(k)[None, :]).astype(jnp.float32)
        in_specs.append(pl.BlockSpec((Dp, k), lambda i: (0, 0)))
        inputs.append(seg)

    per_sample = pl.pallas_call(
        kernel,
        out_shape=jax.ShapeDtypeStruct((Bp_pad, k), jnp.float32),
        grid_spec=pltpu.PrefetchScalarGridSpec(
            num_scalar_prefetch=0,
            grid=grid,
            in_specs=in_specs,
            out_specs=pl.BlockSpec((tile, k), lambda i: (i, 0)),
        ),
        compiler_params=pltpu.CompilerParams(
            # Each grid step owns its output block -> safe to run the batch
            # axis in parallel across v7x's two TensorCores.
            dimension_semantics=("parallel",),
            vmem_limit_bytes=vmem_limit,
        ),
    )(*inputs)

    # Tiny final mean in the wrapper; padded samples sliced away -> exact.
    return jnp.mean(per_sample.reshape(-1)[:B])


def _reference_loss(o1, o2, label, margin=MARGIN):
    diff = o1.astype(jnp.float32) - o2.astype(jnp.float32) + EPS
    dist = jnp.sqrt(jnp.sum(diff * diff, axis=1))
    lbl = label.astype(jnp.float32)
    return jnp.mean((1.0 - lbl) * dist ** 2
                    + lbl * jnp.maximum(margin - dist, 0.0) ** 2)


if __name__ == "__main__":
    # 1) D divides 128 -> packed path with k = 4.
    k1, k2, k3 = jax.random.split(jax.random.PRNGKey(0), 3)
    B, D = 16, 32
    output1 = jax.random.normal(k1, (B, D), dtype=jnp.float32)
    output2 = jax.random.normal(k2, (B, D), dtype=jnp.float32)
    label = jax.random.bernoulli(k3, 0.5, (B,)).astype(jnp.float32)
    loss = jax.block_until_ready(contrastive_loss(output1, output2, label))
    ref = jax.block_until_ready(_reference_loss(output1, output2, label))
    assert jnp.allclose(loss, ref, rtol=1e-4, atol=1e-5), (loss, ref)

    # 2) Awkward D and B -> relaxed floor packing (k = 3, batch padded 22->24).
    k4, k5, k6 = jax.random.split(jax.random.PRNGKey(1), 3)
    B2, D2 = 22, 40
    o1b = jax.random.normal(k4, (B2, D2), dtype=jnp.float32)
    o2b = jax.random.normal(k5, (B2, D2), dtype=jnp.float32)
    lblb = jax.random.bernoulli(k6, 0.5, (B2,)).astype(jnp.float32)
    loss2 = jax.block_until_ready(contrastive_loss(o1b, o2b, lblb))
    ref2 = jax.block_until_ready(_reference_loss(o1b, o2b, lblb))
    assert jnp.allclose(loss2, ref2, rtol=1e-4, atol=1e-5), (loss2, ref2)

    # 3) Wide features in bf16 -> generic k = 1 path, 16-row sublane rounding.
    k7, k8, k9 = jax.random.split(jax.random.PRNGKey(2), 3)
    B3, D3 = 24, 160
    o1c = jax.random.normal(k7, (B3, D3), dtype=jnp.bfloat16)
    o2c = jax.random.normal(k8, (B3, D3), dtype=jnp.bfloat16)
    lblc = jax.random.bernoulli(k9, 0.5, (B3,)).astype(jnp.float32)
    loss3 = jax.block_until_ready(contrastive_loss(o1c, o2c, lblc))
    ref3 = jax.block_until_ready(_reference_loss(o1c, o2c, lblc))
    assert jnp.allclose(loss3, ref3, rtol=1e-4, atol=1e-5), (loss3, ref3)

    print("KERNEL_OK")
</pallas_src>

<mosaic_0001>
module attributes {stable_mosaic.version = 11 : i64} {
  func.func @_contrastive_loss_kernel(%arg0: i32, %arg1: memref<8x128xf32, #tpu.memory_space<vmem>>, %arg2: memref<8x128xf32, #tpu.memory_space<vmem>>, %arg3: memref<8x4xf32, #tpu.memory_space<vmem>>, %arg4: memref<128x4xf32, #tpu.memory_space<vmem>>, %arg5: memref<8x4xf32, #tpu.memory_space<vmem>>) attributes {dimension_semantics = [#tpu.dimension_semantics<parallel>], iteration_bounds = array<i64: 1>, scalar_prefetch = 0 : i64, scratch_operands = 0 : i64, tpu.core_type = #tpu.core_type<tc>, window_params = [{transform_indices = @transform_0, window_bounds = array<i64: 8, 128>}, {transform_indices = @transform_1, window_bounds = array<i64: 8, 128>}, {transform_indices = @transform_2, window_bounds = array<i64: 8, 4>}, {pipeline_mode = #tpu.pipeline_mode<synchronous>, transform_indices = @transform_3, window_bounds = array<i64: 128, 4>}, {transform_indices = @transform_4, window_bounds = array<i64: 8, 4>}]} {
    %c0 = arith.constant 0 : index
    %c0_0 = arith.constant 0 : index
    %0 = vector.load %arg1[%c0, %c0_0] : memref<8x128xf32, #tpu.memory_space<vmem>>, vector<8x128xf32>
    %c0_1 = arith.constant 0 : index
    %c0_2 = arith.constant 0 : index
    %1 = vector.load %arg2[%c0_1, %c0_2] : memref<8x128xf32, #tpu.memory_space<vmem>>, vector<8x128xf32>
    %2 = arith.subf %0, %1 : vector<8x128xf32>
    %cst = arith.constant 9.99999997E-7 : f32
    %3 = vector.broadcast %cst : f32 to vector<8x128xf32>
    %4 = arith.addf %2, %3 : vector<8x128xf32>
    %5 = arith.mulf %4, %4 : vector<8x128xf32>
    %c0_3 = arith.constant 0 : index
    %c0_4 = arith.constant 0 : index
    %6 = vector.load %arg4[%c0_3, %c0_4] : memref<128x4xf32, #tpu.memory_space<vmem>>, vector<128x4xf32>
    %cst_5 = arith.constant dense<0.000000e+00> : vector<8x4xf32>
    %7 = tpu.matmul %5, %6, %cst_5 {dimension_numbers = #tpu.dot_dimension_numbers<[1], [0], [0], [1], [0, 0, 1, 1], [], []>, precision = #tpu.contract_precision<fp32>} : vector<8x128xf32>, vector<128x4xf32>, vector<8x4xf32> -> vector<8x4xf32>
    %8 = math.sqrt %7 : vector<8x4xf32>
    %c0_6 = arith.constant 0 : index
    %c0_7 = arith.constant 0 : index
    %9 = vector.load %arg3[%c0_6, %c0_7] : memref<8x4xf32, #tpu.memory_space<vmem>>, vector<8x4xf32>
    %cst_8 = arith.constant 2.000000e+00 : f32
    %10 = vector.broadcast %cst_8 : f32 to vector<8x4xf32>
    %11 = arith.subf %10, %8 : vector<8x4xf32>
    %cst_9 = arith.constant 0.000000e+00 : f32
    %12 = vector.broadcast %cst_9 : f32 to vector<8x4xf32>
    %13 = arith.maximumf %11, %12 : vector<8x4xf32>
    %cst_10 = arith.constant 1.000000e+00 : f32
    %14 = vector.broadcast %cst_10 : f32 to vector<8x4xf32>
    %15 = arith.subf %14, %9 : vector<8x4xf32>
    %16 = arith.mulf %15, %7 : vector<8x4xf32>
    %17 = arith.mulf %13, %13 : vector<8x4xf32>
    %18 = arith.mulf %9, %17 : vector<8x4xf32>
    %19 = arith.addf %16, %18 : vector<8x4xf32>
    %c0_11 = arith.constant 0 : index
    %c0_12 = arith.constant 0 : index
    %20 = vector.load %arg5[%c0_11, %c0_12] : memref<8x4xf32, #tpu.memory_space<vmem>>, vector<8x4xf32>
    tpu.vector_store %arg5[%c0_11, %c0_12], %19 {strides = array<i32>} : memref<8x4xf32, #tpu.memory_space<vmem>>, vector<8x4xf32>,
    return
  }
  func.func @transform_0(%arg0: i32) -> (i32, i32) {
    %c0_i32 = arith.constant 0 : i32
    %c0_i32_0 = arith.constant 0 : i32
    return %arg0, %c0_i32 : i32, i32
  }
  func.func @transform_1(%arg0: i32) -> (i32, i32) {
    %c0_i32 = arith.constant 0 : i32
    %c0_i32_0 = arith.constant 0 : i32
    return %arg0, %c0_i32 : i32, i32
  }
  func.func @transform_2(%arg0: i32) -> (i32, i32) {
    %c0_i32 = arith.constant 0 : i32
    %c0_i32_0 = arith.constant 0 : i32
    return %arg0, %c0_i32 : i32, i32
  }
  func.func @transform_3(%arg0: i32) -> (i32, i32) {
    %c0_i32 = arith.constant 0 : i32
    %c0_i32_0 = arith.constant 0 : i32
    %c0_i32_1 = arith.constant 0 : i32
    return %c0_i32, %c0_i32_0 : i32, i32
  }
  func.func @transform_4(%arg0: i32) -> (i32, i32) {
    %c0_i32 = arith.constant 0 : i32
    %c0_i32_0 = arith.constant 0 : i32
    return %arg0, %c0_i32 : i32, i32
  }
}

</mosaic_0001>

<bundles_post_ra>
// kernel: tpu_custom_call.1
= control target key start
LH: loop header
LB: loop body
LE: loop exit
PB: predicated region body
PF: predicated region fallthrough
CT: control target
= control target key end

     0   :  { %v1016_v0 = vmov 0.0   ;;  %vm1017_vm0 = vmmov 0   ;;  %vm694_vm3 = vcmask 31744   ;;  %s1466_s3 = inlined_call_operand.vmem [shape: f32[128,4], index: 3, kind: input, shape index: {}]   ;;  %s1467_s0 = inlined_call_operand.vmem [shape: f32[8,128], index: 0, kind: input, shape index: {}]   ;;  %s1468_s1 = inlined_call_operand.vmem [shape: f32[8,128], index: 1, kind: input, shape index: {}]   ;;  %s1469_s2 = inlined_call_operand.vmem [shape: f32[8,4], index: 2, kind: input, shape index: {}]   ;;  %s1470_s4 = inlined_call_operand.vmem [shape: f32[8,4], index: 4, kind: output, shape index: {}]  }
   0x1   :  { %802 = vmatprep.subr.mxu0 %v1016_v0  ;;  %v37_v1 = vld [vmem:[%s1466_s3 + $0x78] sm:$0xff]  ;;  %v36_v2 = vld [vmem:[%s1466_s3 + $0x70] sm:$0xff]  ;;  %v35_v3 = vld [vmem:[%s1466_s3 + $0x68] sm:$0xff]  ;;  %837 = vmatprep.subr.mxu1 %v1016_v0 }
   0x2   :  { %v1054_v4 = vand.u32 4294901760, %v37_v1  ;;  %v1056_v5 = vand.u32 4294901760, %v36_v2  ;;  %v1058_v6 = vand.u32 4294901760, %v35_v3  ;;  %v34_v7 = vld [vmem:[%s1466_s3 + $0x60] sm:$0xff]  ;;  %v33_v8 = vld [vmem:[%s1466_s3 + $0x58] sm:$0xff]  ;;  %v32_v9 = vld [vmem:[%s1466_s3 + $0x50] sm:$0xff]  ;;  %834 = vmatprep.mubr.msk.f32.mxu0 %vm1017_vm0, %v1016_v0  ;;  %869 = vmatprep.mubr.msk.f32.mxu1 %vm1017_vm0, %v1016_v0 }
   0x3   :  { %v1073_v10 = vand.u32 4294901760, %v34_v7  ;;  %v1075_v11 = vand.u32 4294901760, %v33_v8  ;;  %v1077_v12 = vand.u32 4294901760, %v32_v9  ;;  %v31_v13 = vld [vmem:[%s1466_s3 + $0x48] sm:$0xff]  ;;  %v30_v14 = vld [vmem:[%s1466_s3 + $0x40] sm:$0xff]  ;;  %v29_v19 = vld [vmem:[%s1466_s3 + $0x38] sm:$0xff] }
   0x4   :  { %803 = vmatpush3.msra.mxu0 %v1054_v4  ;;  %v1087_v15 = vsub.f32 %v37_v1, %v1054_v4  ;;  %v1090_v16 = vsub.f32 %v36_v2, %v1056_v5  ;;  %v1092_v17 = vand.u32 4294901760, %v31_v13  ;;  %v1095_v18 = vsub.f32 %v35_v3, %v1058_v6  ;;  %v28_v26 = vld [vmem:[%s1466_s3 + $0x30] sm:$0xff]  ;;  %v27_v36 = vld [vmem:[%s1466_s3 + $0x28] sm:$0xff]  ;;  %v26_v41 = vld [vmem:[%s1466_s3 + $0x20] sm:$0xff] }
   0x5   :  { %804 = vmatprep.subr.mxu0 %v1016_v0  ;;  %v1102_v20 = vsub.f32 %v34_v7, %v1073_v10  ;;  %v1105_v21 = vsub.f32 %v33_v8, %v1075_v11  ;;  %v1111_v25 = vand.u32 4294901760, %v30_v14  ;;  %v1118_v28 = vand.u32 4294901760, %v29_v19  ;;  %v17_v48 = vld [vmem:[%s1467_s0] sm:$0xff]  ;;  %v25_v51 = vld [vmem:[%s1466_s3 + $0x18] sm:$0xff]  ;;  %v24_v55 = vld [vmem:[%s1466_s3 + $0x10] sm:$0xff] }
   0x6   :  { %805 = vmatpush3.msra.mxu0 %v1056_v5  ;;  %v132_v22 = vand.u32 4294901760, %v1087_v15  ;;  %v139_v23 = vand.u32 4294901760, %v1090_v16  ;;  %v146_v24 = vand.u32 4294901760, %v1095_v18  ;;  %v1122_v30 = vsub.f32 %v32_v9, %v1077_v12  ;;  %v18_v49 = vld [vmem:[%s1468_s1] sm:$0xff]  ;;  %v23_v62 = vld [vmem:[%s1466_s3 + $0x8] sm:$0xff] }
   0x7   :  { %806 = vmatprep.subr.mxu0 %v1016_v0  ;;  %v153_v27 = vand.u32 4294901760, %v1102_v20  ;;  %v160_v29 = vand.u32 4294901760, %v1105_v21  ;;  %v1135_v34 = vsub.f32 %v31_v13, %v1092_v17  ;;  %v1138_v35 = vand.u32 4294901760, %v28_v26  ;;  %v22_v9 = vld [vmem:[%s1466_s3] sm:$0xff] }
   0x8   :  { %807 = vmatpush3.msra.mxu0 %v1058_v6  ;;  %v133_v31 = vsub.f32 %v1087_v15, %v132_v22  ;;  %v140_v32 = vsub.f32 %v1090_v16, %v139_v23  ;;  %v147_v33 = vsub.f32 %v1095_v18, %v146_v24  ;;  %v167_v40 = vand.u32 4294901760, %v1122_v30 }
   0x9   :  { %808 = vmatprep.subr.mxu0 %v1016_v0  ;;  %v154_v39 = vsub.f32 %v1102_v20, %v153_v27  ;;  %v161_v42 = vsub.f32 %v1105_v21, %v160_v29  ;;  %v1156_v43 = vsub.f32 %v30_v14, %v1111_v25  ;;  %v1159_v45 = vand.u32 4294901760, %v27_v36 }
   0xa   :  { %809 = vmatpush3.msra.mxu0 %v1073_v10  ;;  %v134_v37 = vand.u32 4294901760, %v133_v31  ;;  %v141_v38 = vand.u32 4294901760, %v140_v32  ;;  %v148_v44 = vand.u32 4294901760, %v147_v33  ;;  %v174_v46 = vand.u32 4294901760, %v1135_v34 }
   0xb   :  { %810 = vmatprep.subr.mxu0 %v1016_v0  ;;  %v1163_v47 = vsub.f32 %v29_v19, %v1118_v28  ;;  %v1173_v50 = vand.u32 4294901760, %v26_v41  ;;  %v155_v52 = vand.u32 4294901760, %v154_v39  ;;  %v168_v53 = vsub.f32 %v1122_v30, %v167_v40 }
   0xc   :  { %811 = vmatpush3.msra.mxu0 %v1075_v11  ;;  %838 = vmatpush3.msra.mxu1 %v134_v37  ;;  %v181_v54 = vand.u32 4294901760, %v1156_v43  ;;  %v1187_v56 = vsub.f32 %v28_v26, %v1138_v35  ;;  %v162_v57 = vand.u32 4294901760, %v161_v42  ;;  %v19_v58 = vsub.f32 %v17_v48, %v18_v49 }
   0xd   :  { %812 = vmatprep.subr.mxu0 %v1016_v0  ;;  %839 = vmatprep.subr.mxu1 %v1016_v0  ;;  %v175_v59 = vsub.f32 %v1135_v34, %v174_v46  ;;  %v1195_v60 = vand.u32 4294901760, %v25_v51  ;;  %v188_v61 = vand.u32 4294901760, %v1163_v47  ;;  %v1202_v63 = vsub.f32 %v27_v36, %v1159_v45 }
   0xe   :  { %813 = vmatpush3.msra.mxu0 %v1077_v12  ;;  %840 = vmatpush3.msra.mxu1 %v141_v38  ;;  %v1206_v1 = vand.u32 4294901760, %v24_v55  ;;  %v20_v2 = vadd.f32 1e-06, %v19_v58  ;;  %v169_v3 = vand.u32 4294901760, %v168_v53  ;;  %v182_v7 = vsub.f32 %v1156_v43, %v181_v54 }
   0xf   :  { %814 = vmatprep.subr.mxu0 %v1016_v0  ;;  %841 = vmatprep.subr.mxu1 %v1016_v0  ;;  %v195_v8 = vand.u32 4294901760, %v1187_v56  ;;  %v1217_v13 = vsub.f32 %v26_v41, %v1173_v50  ;;  %v1221_v14 = vand.u32 4294901760, %v23_v62  ;;  %v176_v26 = vand.u32 4294901760, %v175_v59 }
  0x10   :  { %815 = vmatpush3.msra.mxu0 %v1092_v17  ;;  %842 = vmatpush3.msra.mxu1 %v148_v44  ;;  %v21_v19 = vmul.f32 %v20_v2, %v20_v2  ;;  %v189_v31 = vsub.f32 %v1163_v47, %v188_v61  ;;  %v202_v32 = vand.u32 4294901760, %v1202_v63  ;;  %v1229_v33 = vsub.f32 %v25_v51, %v1195_v60 }
  0x11   :  { %816 = vmatprep.subr.mxu0 %v1016_v0  ;;  %843 = vmatprep.subr.mxu1 %v1016_v0  ;;  %v1233_v36 = vand.u32 4294901760, %v22_v9  ;;  %v183_v38 = vand.u32 4294901760, %v182_v7  ;;  %v196_v39 = vsub.f32 %v1187_v56, %v195_v8  ;;  %v209_v41 = vand.u32 4294901760, %v1217_v13 }
  0x12   :  { %817 = vmatpush3.msra.mxu0 %v1111_v25  ;;  %844 = vmatpush3.msra.mxu1 %v155_v52  ;;  %v1235_v37 = vand.u32 4294901760, %v21_v19  ;;  %v1243_v42 = vsub.f32 %v24_v55, %v1206_v1  ;;  %v190_v48 = vand.u32 4294901760, %v189_v31  ;;  %v203_v49 = vsub.f32 %v1202_v63, %v202_v32 }
  0x13   :  { %818 = vmatprep.subr.mxu0 %v1016_v0  ;;  %845 = vmatprep.subr.mxu1 %v1016_v0  ;;  %v216_v51 = vand.u32 4294901760, %v1229_v33  ;;  %v1256_v52 = vsub.f32 %v23_v62, %v1221_v14  ;;  %v197_v55 = vand.u32 4294901760, %v196_v39  ;;  %v1267_v59 = vsub.f32 %v22_v9, %v1233_v36 }
  0x14   :  { %819 = vmatpush3.msra.mxu0 %v1118_v28  ;;  %846 = vmatpush3.msra.mxu1 %v162_v57  ;;  %v1248_v44 = vsub.f32 %v21_v19, %v1235_v37  ;;  %v210_v57 = vsub.f32 %v1217_v13, %v209_v41  ;;  %v223_v58 = vand.u32 4294901760, %v1243_v42  ;;  %v204_v62 = vand.u32 4294901760, %v203_v49 }
  0x15   :  { %820 = vmatprep.subr.mxu0 %v1016_v0  ;;  %847 = vmatprep.subr.mxu1 %v1016_v0  ;;  %v230_v7 = vand.u32 4294901760, %v1256_v52 }
  0x16   :  { %821 = vmatpush3.msra.mxu0 %v1138_v35  ;;  %848 = vmatpush3.msra.mxu1 %v169_v3  ;;  %v121_v53 = vand.u32 4294901760, %v1248_v44  ;;  %v217_v3 = vsub.f32 %v1229_v33, %v216_v51  ;;  %v211_v9 = vand.u32 4294901760, %v210_v57  ;;  %v224_v19 = vsub.f32 %v1243_v42, %v223_v58 }
  0x17   :  { %822 = vmatprep.subr.mxu0 %v1016_v0  ;;  %849 = vmatprep.subr.mxu1 %v1016_v0  ;;  %v231_v39 = vsub.f32 %v1256_v52, %v230_v7 }
  0x18   :  { %823 = vmatpush3.msra.mxu0 %v1159_v45  ;;  %850 = vmatpush3.msra.mxu1 %v176_v26  ;;  %v122_v2 = vsub.f32 %v1248_v44, %v121_v53  ;;  %v237_v26 = vand.u32 4294901760, %v1267_v59 }
  0x19   :  { %824 = vmatprep.subr.mxu0 %v1016_v0  ;;  %851 = vmatprep.subr.mxu1 %v1016_v0 }
  0x1a   :  { %825 = vmatpush3.msra.mxu0 %v1173_v50  ;;  %852 = vmatpush3.msra.mxu1 %v183_v38  ;;  %v123_v31 = vand.u32 4294901760, %v122_v2  ;;  %v218_v38 = vand.u32 4294901760, %v217_v3  ;;  %v238_v49 = vsub.f32 %v1267_v59, %v237_v26 }
  0x1b   :  { %826 = vmatprep.subr.mxu0 %v1016_v0  ;;  %853 = vmatprep.subr.mxu1 %v1016_v0 }
  0x1c   :  { %827 = vmatpush3.msra.mxu0 %v1195_v60  ;;  %854 = vmatpush3.msra.mxu1 %v190_v48  ;;  %v225_v48 = vand.u32 4294901760, %v224_v19  ;;  %v239_v57 = vand.u32 4294901760, %v238_v49 }
  0x1d   :  { %828 = vmatprep.subr.mxu0 %v1016_v0  ;;  %855 = vmatprep.subr.mxu1 %v1016_v0 }
  0x1e   :  { %829 = vmatpush3.msra.mxu0 %v1206_v1  ;;  %856 = vmatpush3.msra.mxu1 %v197_v55  ;;  %v232_v55 = vand.u32 4294901760, %v231_v39 }
  0x1f   :  { %830 = vmatprep.subr.mxu0 %v1016_v0  ;;  %857 = vmatprep.subr.mxu1 %v1016_v0 }
  0x20   :  { %831 = vmatpush3.msra.mxu0 %v1221_v14  ;;  %858 = vmatpush3.msra.mxu1 %v204_v62 }
  0x21   :  { %832 = vmatprep.subr.mxu0 %v1016_v0  ;;  %859 = vmatprep.subr.mxu1 %v1016_v0 }
  0x22   :  { %833 = vmatpush3.msra.mxu0 %v1233_v36  ;;  %860 = vmatpush3.msra.mxu1 %v211_v9 }
  0x23   :  { %861 = vmatprep.subr.mxu1 %v1016_v0  ;;  %872 = vmatprep.subr.mxu0 %v1016_v0 }
  0x24   :  { %835 = vmatmul.mubr.f32.vlgmr.msra.gmra.mxu0 %v123_v31  ;;  %862 = vmatpush3.msra.mxu1 %v218_v38 }
  0x25   :  { %873 = vmatpush3.msra.mxu0 %v1087_v15  ;;  %863 = vmatprep.subr.mxu1 %v1016_v0 }
  0x26   :  { %874 = vmatprep.subr.mxu0 %v1016_v0  ;;  %864 = vmatpush3.msra.mxu1 %v225_v48 }
  0x27   :  { %875 = vmatpush3.msra.mxu0 %v1090_v16  ;;  %865 = vmatprep.subr.mxu1 %v1016_v0 }
  0x28   :  { %876 = vmatprep.subr.mxu0 %v1016_v0  ;;  %866 = vmatpush3.msra.mxu1 %v232_v55 }
  0x29   :  { %877 = vmatpush3.msra.mxu0 %v1095_v18  ;;  %867 = vmatprep.subr.mxu1 %v1016_v0 }
  0x2a   :  { %878 = vmatprep.subr.mxu0 %v1016_v0  ;;  %868 = vmatpush3.msra.mxu1 %v239_v57 }
  0x2b   :  { %879 = vmatpush3.msra.mxu0 %v1102_v20  ;;  %870 = vmatmul.mubr.f32.vlgmr.msra.gmra.mxu1 %v1235_v37 }
  0x2c   :  { %880 = vmatprep.subr.mxu0 %v1016_v0  ;;  %907 = vmatprep.subr.mxu1 %v1016_v0 }
  0x2d   :  { %881 = vmatpush3.msra.mxu0 %v1105_v21  ;;  %908 = vmatpush3.msra.mxu1 %v1054_v4 }
  0x2e   :  { %882 = vmatprep.subr.mxu0 %v1016_v0  ;;  %909 = vmatprep.subr.mxu1 %v1016_v0 }
  0x2f   :  { %883 = vmatpush3.msra.mxu0 %v1122_v30  ;;  %910 = vmatpush3.msra.mxu1 %v1056_v5 }
  0x30   :  { %884 = vmatprep.subr.mxu0 %v1016_v0  ;;  %911 = vmatprep.subr.mxu1 %v1016_v0 }
  0x31   :  { %885 = vmatpush3.msra.mxu0 %v1135_v34  ;;  %912 = vmatpush3.msra.mxu1 %v1058_v6 }
  0x32   :  { %886 = vmatprep.subr.mxu0 %v1016_v0  ;;  %913 = vmatprep.subr.mxu1 %v1016_v0 }
  0x33   :  { %887 = vmatpush3.msra.mxu0 %v1156_v43  ;;  %914 = vmatpush3.msra.mxu1 %v1073_v10 }
  0x34   :  { %888 = vmatprep.subr.mxu0 %v1016_v0  ;;  %915 = vmatprep.subr.mxu1 %v1016_v0 }
  0x35   :  { %889 = vmatpush3.msra.mxu0 %v1163_v47  ;;  %916 = vmatpush3.msra.mxu1 %v1075_v11 }
  0x36   :  { %890 = vmatprep.subr.mxu0 %v1016_v0  ;;  %917 = vmatprep.subr.mxu1 %v1016_v0 }
  0x37   :  { %891 = vmatpush3.msra.mxu0 %v1187_v56  ;;  %918 = vmatpush3.msra.mxu1 %v1077_v12 }
  0x38   :  { %892 = vmatprep.subr.mxu0 %v1016_v0  ;;  %919 = vmatprep.subr.mxu1 %v1016_v0 }
  0x39   :  { %893 = vmatpush3.msra.mxu0 %v1202_v63  ;;  %920 = vmatpush3.msra.mxu1 %v1092_v17 }
  0x3a   :  { %894 = vmatprep.subr.mxu0 %v1016_v0  ;;  %921 = vmatprep.subr.mxu1 %v1016_v0 }
  0x3b   :  { %895 = vmatpush3.msra.mxu0 %v1217_v13  ;;  %922 = vmatpush3.msra.mxu1 %v1111_v25 }
  0x3c   :  { %896 = vmatprep.subr.mxu0 %v1016_v0  ;;  %923 = vmatprep.subr.mxu1 %v1016_v0 }
  0x3d   :  { %897 = vmatpush3.msra.mxu0 %v1229_v33  ;;  %924 = vmatpush3.msra.mxu1 %v1118_v28 }
  0x3e   :  { %898 = vmatprep.subr.mxu0 %v1016_v0  ;;  %925 = vmatprep.subr.mxu1 %v1016_v0 }
  0x3f   :  { %899 = vmatpush3.msra.mxu0 %v1243_v42  ;;  %926 = vmatpush3.msra.mxu1 %v1138_v35 }
  0x40   :  { %900 = vmatprep.subr.mxu0 %v1016_v0  ;;  %927 = vmatprep.subr.mxu1 %v1016_v0 }
  0x41   :  { %901 = vmatpush3.msra.mxu0 %v1256_v52  ;;  %928 = vmatpush3.msra.mxu1 %v1159_v45 }
  0x42   :  { %902 = vmatprep.subr.mxu0 %v1016_v0  ;;  %929 = vmatprep.subr.mxu1 %v1016_v0 }
  0x43   :  { %903 = vmatpush3.msra.mxu0 %v1267_v59  ;;  %904 = vmatprep.mubr.msk.f32.mxu0 %vm1017_vm0, %v1016_v0 }
  0x44   :  { %930 = vmatpush3.msra.mxu1 %v1173_v50  ;;  %905 = vmatmul.mubr.f32.vlgmr.msra.gmra.mxu0 %v1248_v44 }
  0x45   :  { %931 = vmatprep.subr.mxu1 %v1016_v0  ;;  %942 = vmatprep.subr.mxu0 %v1016_v0 }
  0x46   :  { %932 = vmatpush3.msra.mxu1 %v1195_v60  ;;  %943 = vmatpush3.msra.mxu0 %v132_v22 }
  0x47   :  { %933 = vmatprep.subr.mxu1 %v1016_v0  ;;  %944 = vmatprep.subr.mxu0 %v1016_v0 }
  0x48   :  { %934 = vmatpush3.msra.mxu1 %v1206_v1  ;;  %945 = vmatpush3.msra.mxu0 %v139_v23 }
  0x49   :  { %935 = vmatprep.subr.mxu1 %v1016_v0  ;;  %946 = vmatprep.subr.mxu0 %v1016_v0 }
  0x4a   :  { %936 = vmatpush3.msra.mxu1 %v1221_v14  ;;  %947 = vmatpush3.msra.mxu0 %v146_v24 }
  0x4b   :  { %937 = vmatprep.subr.mxu1 %v1016_v0  ;;  %948 = vmatprep.subr.mxu0 %v1016_v0 }
  0x4c   :  { %938 = vmatpush3.msra.mxu1 %v1233_v36  ;;  %939 = vmatprep.mubr.msk.f32.mxu1 %vm1017_vm0, %v1016_v0 }
  0x4d   :  { %949 = vmatpush3.msra.mxu0 %v153_v27  ;;  %940 = vmatmul.mubr.f32.vlgmr.msra.gmra.mxu1 %v121_v53 }
  0x4e   :  { %950 = vmatprep.subr.mxu0 %v1016_v0  ;;  %977 = vmatprep.subr.mxu1 %v1016_v0 }
  0x4f   :  { %951 = vmatpush3.msra.mxu0 %v160_v29  ;;  %978 = vmatpush3.msra.mxu1 %v1054_v4 }
  0x50   :  { %952 = vmatprep.subr.mxu0 %v1016_v0  ;;  %979 = vmatprep.subr.mxu1 %v1016_v0 }
  0x51   :  { %953 = vmatpush3.msra.mxu0 %v167_v40  ;;  %980 = vmatpush3.msra.mxu1 %v1056_v5 }
  0x52   :  { %954 = vmatprep.subr.mxu0 %v1016_v0  ;;  %981 = vmatprep.subr.mxu1 %v1016_v0 }
  0x53   :  { %955 = vmatpush3.msra.mxu0 %v174_v46  ;;  %982 = vmatpush3.msra.mxu1 %v1058_v6 }
  0x54   :  { %956 = vmatprep.subr.mxu0 %v1016_v0  ;;  %983 = vmatprep.subr.mxu1 %v1016_v0 }
  0x55   :  { %957 = vmatpush3.msra.mxu0 %v181_v54  ;;  %984 = vmatpush3.msra.mxu1 %v1073_v10 }
  0x56   :  { %958 = vmatprep.subr.mxu0 %v1016_v0  ;;  %985 = vmatprep.subr.mxu1 %v1016_v0 }
  0x57   :  { %959 = vmatpush3.msra.mxu0 %v188_v61  ;;  %986 = vmatpush3.msra.mxu1 %v1075_v11 }
  0x58   :  { %960 = vmatprep.subr.mxu0 %v1016_v0  ;;  %987 = vmatprep.subr.mxu1 %v1016_v0 }
  0x59   :  { %961 = vmatpush3.msra.mxu0 %v195_v8  ;;  %988 = vmatpush3.msra.mxu1 %v1077_v12 }
  0x5a   :  { %962 = vmatprep.subr.mxu0 %v1016_v0  ;;  %989 = vmatprep.subr.mxu1 %v1016_v0 }
  0x5b   :  { %963 = vmatpush3.msra.mxu0 %v202_v32  ;;  %990 = vmatpush3.msra.mxu1 %v1092_v17 }
  0x5c   :  { %964 = vmatprep.subr.mxu0 %v1016_v0  ;;  %991 = vmatprep.subr.mxu1 %v1016_v0 }
  0x5d   :  { %965 = vmatpush3.msra.mxu0 %v209_v41  ;;  %992 = vmatpush3.msra.mxu1 %v1111_v25 }
  0x5e   :  { %966 = vmatprep.subr.mxu0 %v1016_v0  ;;  %993 = vmatprep.subr.mxu1 %v1016_v0 }
  0x5f   :  { %967 = vmatpush3.msra.mxu0 %v216_v51  ;;  %994 = vmatpush3.msra.mxu1 %v1118_v28 }
  0x60   :  { %968 = vmatprep.subr.mxu0 %v1016_v0  ;;  %995 = vmatprep.subr.mxu1 %v1016_v0 }
  0x61   :  { %969 = vmatpush3.msra.mxu0 %v223_v58  ;;  %996 = vmatpush3.msra.mxu1 %v1138_v35  ;;  %v686_v35 = vld [vmem:[%s1469_s2] sm:$0xff] }
  0x62   :  { %970 = vmatprep.subr.mxu0 %v1016_v0  ;;  %997 = vmatprep.subr.mxu1 %v1016_v0 }
  0x63   :  { %971 = vmatpush3.msra.mxu0 %v230_v7  ;;  %998 = vmatpush3.msra.mxu1 %v1159_v45  ;;  %v689_v45 = vsub.f32 1.0, %v686_v35 }
  0x64   :  { %972 = vmatprep.subr.mxu0 %v1016_v0  ;;  %999 = vmatprep.subr.mxu1 %v1016_v0 }
  0x65   :  { %973 = vmatpush3.msra.mxu0 %v237_v26  ;;  %974 = vmatprep.mubr.msk.f32.mxu0 %vm1017_vm0, %v1016_v0 }
  0x66   :  { %1000 = vmatpush3.msra.mxu1 %v1173_v50  ;;  %975 = vmatmul.mubr.f32.vlgmr.msra.gmra.mxu0 %v1235_v37 }
  0x67   :  { %1001 = vmatprep.subr.mxu1 %v1016_v0  ;;  %1009 = vmatprep.mubr.msk.f32.mxu1 %vm1017_vm0, %v1016_v0 }
  0x68   :  { %1002 = vmatpush3.msra.mxu1 %v1195_v60 }
  0x69   :  { %1003 = vmatprep.subr.mxu1 %v1016_v0 }
  0x6a   :  { %1004 = vmatpush3.msra.mxu1 %v1206_v1 }
  0x6b   :  { %1005 = vmatprep.subr.mxu1 %v1016_v0 }
  0x6c   :  { %1006 = vmatpush3.msra.mxu1 %v1221_v14 }
  0x6d   :  { %1007 = vmatprep.subr.mxu1 %v1016_v0 }
  0x6e   :  { %1008 = vmatpush3.msra.mxu1 %v1233_v36 }
  0x6f   :  { %1010 = vmatmul.mubr.f32.vlgmr.msra.gmra.mxu1 %v1235_v37 }
  0xe4   :  { %v125_v4 = vpop.f32.mrf.mxu0 }
  0xe6   :  { %v836_v5 = vpop.f32.mrf.mxu0 }
  0xeb   :  { %v276_v6 = vpop.f32.mrf.mxu1 }
  0xec   :  { %v277_v18 = vadd.f32 %v276_v6, %v125_v4 }
  0xed   :  { %v871_v10 = vpop.f32.mrf.mxu1 }
 0x104   :  { %v380_v11 = vpop.f32.mrf.mxu0 }
 0x105   :  { %v381_v21 = vadd.f32 %v380_v11, %v277_v18 }
 0x106   :  { %v906_v12 = vpop.f32.mrf.mxu0 }
 0x10d   :  { %v469_v15 = vpop.f32.mrf.mxu1 }
 0x10e   :  { %v470_v22 = vadd.f32 %v469_v15, %v381_v21 }
 0x10f   :  { %v941_v16 = vpop.f32.mrf.mxu1 }
 0x126   :  { %v588_v17 = vpop.f32.mrf.mxu0 }
 0x127   :  { %v589_v23 = vadd.f32 %v588_v17, %v470_v22 }
 0x128   :  { %v976_v20 = vpop.f32.mrf.mxu0 }
 0x12f   :  { %v675_v24 = vpop.f32.mrf.mxu1 }
 0x130   :  { %v676_v0 = vadd.f32 %v675_v24, %v589_v23 }
 0x131   :  { %v1011_v25 = vpop.f32.mrf.mxu1 }
 0x132   :  { %1014 = vrsqrt.f32 %v676_v0  ;;  %vm681_vm1 = vcmp.eq.f32.partialorder %v676_v0, inf  ;;  %v684_v29 = vand.u32 2147483648, %v676_v0  ;;  %vm683_vm2 = vcmp.eq.f32.partialorder %v676_v0, 0.0 }
 0x133   :  { %v690_v47 = vmul.f32 %v689_v45, %v676_v0 }
 0x13f   :  { %v1015_v27 = vpop.eup %1014 }
 0x140   :  { %v680_v28 = vmul.f32 %v1015_v27, %v676_v0 }
 0x142   :  { %v682_v30 = vsel %vm681_vm1, %v676_v0, %v680_v28 }
 0x143   :  { %v685_v34 = vsel %vm683_vm2, %v684_v29, %v682_v30 }
 0x144   :  { %v687_v40 = vsub.f32 2.0, %v685_v34 }
 0x146   :  { %v688_v43 = vmax.f32 %v687_v40, 0.0 }
 0x148   :  { %v691_v46 = vmul.f32 %v688_v43, %v688_v43 }
 0x14a   :  { %v692_v50 = vmul.f32 %v691_v46, %v686_v35 }
 0x14c   :  { %v693_v54 = vadd.f32 %v692_v50, %v690_v47 }
 0x14e   :  { %695 = vst.msk [vmem:[%s1470_s4] sm:$0xff] %vm694_vm3, %v693_v54 }

</bundles_post_ra>
